<compile_context>
chip_gen: v6e
topology: v6e:2x2x1
jax: 0.10.0
libtpu: 0.0.40
codegen_flags: <defaults>
</compile_context>

<pallas_src>
import functools

import jax
import jax.numpy as jnp
from jax.experimental import pallas as pl
from jax.experimental.pallas import tpu as pltpu


def _mlp_kernel(nlayers, *refs):
    """refs = (x_ref, w0, b0, w1, b1, ..., wL, bL, out_ref).

    Transposed layout: x_ref is (ni, bt) with batch on the lane axis, weights
    are (out_features, in_features), biases are (out_features, 1), and the
    output block is (1, bt).
    """
    x_ref = refs[0]
    out_ref = refs[-1]
    param_refs = refs[1:-1]
    assert len(param_refs) == 2 * nlayers

    h = x_ref[...].astype(jnp.float32)                        # (in, bt)
    for i in range(nlayers):
        w = param_refs[2 * i][...]                            # (out, in)
        b = param_refs[2 * i + 1][...].astype(jnp.float32)    # (out, 1)
        # bf16 operands on the MXU, f32 accumulation; elementwise math in f32.
        h = jnp.dot(w.astype(jnp.bfloat16), h.astype(jnp.bfloat16),
                    preferred_element_type=jnp.float32) + b
        if i < nlayers - 1:  # final Linear has no activation
            h = jnp.tanh(h)
    out_ref[...] = h.astype(out_ref.dtype)


def nlunit_multibody_forward(x, params, *, batch_tile=512):
    """x: (B, ni) float32 (PyTorch row-per-sample convention).

    params: list of (W, b) with W = (out_features, in_features) (PyTorch
    storage order) and b = (out_features,).  Returns (B, 1) float32.
    """
    B, ni = x.shape
    nlayers = len(params)
    n = params[0][0].shape[0]

    # Lane-align the batch: tile is a multiple of 128; pad B up to a tile multiple.
    bt = min(batch_tile, ((B + 127) // 128) * 128)
    bt = max(bt, 128)
    B_pad = ((B + bt - 1) // bt) * bt
    num_tiles = B_pad // bt

    # Batch on lanes: (ni, B_pad); padded columns are zeros and sliced off later.
    xt = jnp.zeros((ni, B_pad), jnp.float32).at[:, :B].set(x.T.astype(jnp.float32))

    flat = []
    for (w, b) in params:
        flat.append(jnp.asarray(w, jnp.float32))
        flat.append(jnp.asarray(b, jnp.float32).reshape(-1, 1))

    kernel = functools.partial(_mlp_kernel, nlayers)

    in_specs = [pl.BlockSpec((ni, bt), lambda i: (0, i))]
    for arr in flat:
        # Weights/biases are tiny -> full-array blocks, VMEM-resident across tiles.
        in_specs.append(pl.BlockSpec(arr.shape, lambda i: (0, 0)))

    # Advisory cost estimate so XLA schedules/overlaps this call sensibly.
    flops = 2 * B_pad * sum(int(w.shape[0]) * int(w.shape[1]) for (w, _) in params)
    transcendentals = B_pad * n * (nlayers - 1)
    bytes_accessed = 4 * (B_pad * (ni + 1)
                          + sum(int(w.size) + int(b.size) for (w, b) in params))

    out = pl.pallas_call(
        kernel,
        grid=(num_tiles,),
        in_specs=in_specs,
        out_specs=pl.BlockSpec((1, bt), lambda i: (0, i)),
        out_shape=jax.ShapeDtypeStruct((1, B_pad), jnp.float32),
        compiler_params=pltpu.CompilerParams(
            dimension_semantics=("parallel",),      # v7x: shard batch tiles across 2 TCs
            vmem_limit_bytes=32 * 1024 * 1024,      # explicit bound, safe on v7x's 64 MiB
        ),
        cost_estimate=pl.CostEstimate(
            flops=flops,
            transcendentals=transcendentals,
            bytes_accessed=bytes_accessed,
        ),
    )(xt, *flat)

    return out[:, :B].T  # back to (B, 1)


def init_params(key, ni, n, nl):
    """Deterministic init matching the module's layer shapes.

    Layers: Linear(ni, n), [Linear(n, n)] * (nl - 1), Linear(n, 1).
    Stored in PyTorch convention: W shape = (out_features, in_features).
    """
    dims = [(ni, n)] + [(n, n)] * (nl - 1) + [(n, 1)]
    params = []
    for (fan_in, fan_out) in dims:
        key, kw, kb = jax.random.split(key, 3)
        bound = float(fan_in) ** -0.5  # PyTorch default uniform(-1/sqrt(in), 1/sqrt(in))
        w = jax.random.uniform(kw, (fan_out, fan_in), jnp.float32, -bound, bound)
        b = jax.random.uniform(kb, (fan_out,), jnp.float32, -bound, bound)
        params.append((w, b))
    return params


def reference_forward(x, params):
    """Pure-JAX f32 reference (PyTorch semantics: h = h @ W.T + b)."""
    h = x
    for i, (w, b) in enumerate(params):
        h = h @ w.T + b
        if i < len(params) - 1:
            h = jnp.tanh(h)
    return h


if __name__ == "__main__":
    ni, n, nl = 4, 32, 3   # ni input features, hidden width n, nl hidden blocks
    batch = 8

    key = jax.random.PRNGKey(0)
    key, kx = jax.random.split(key)
    x = jax.random.normal(kx, (batch, ni), jnp.float32)

    params = init_params(key, ni, n, nl)

    out = jax.block_until_ready(nlunit_multibody_forward(x, params))
    ref = reference_forward(x, params)

    assert out.shape == (batch, 1), out.shape
    # bf16 MXU operands + f32 accumulation -> looser tolerance than a pure-f32 path.
    assert jnp.allclose(out, ref, atol=5e-2, rtol=5e-2), (out, ref)

    print("KERNEL_OK")
</pallas_src>

<mosaic_0001>
module attributes {stable_mosaic.version = 11 : i64} {
  func.func @_mlp_kernel(%arg0: i32, %arg1: memref<4x128xf32, #tpu.memory_space<vmem>>, %arg2: memref<32x4xf32, #tpu.memory_space<vmem>>, %arg3: memref<32x1xf32, #tpu.memory_space<vmem>>, %arg4: memref<32x32xf32, #tpu.memory_space<vmem>>, %arg5: memref<32x1xf32, #tpu.memory_space<vmem>>, %arg6: memref<32x32xf32, #tpu.memory_space<vmem>>, %arg7: memref<32x1xf32, #tpu.memory_space<vmem>>, %arg8: memref<1x32xf32, #tpu.memory_space<vmem>>, %arg9: memref<1x1xf32, #tpu.memory_space<vmem>>, %arg10: memref<1x128xf32, #tpu.memory_space<vmem>>) attributes {dimension_semantics = [#tpu.dimension_semantics<parallel>], iteration_bounds = array<i64: 1>, scalar_prefetch = 0 : i64, scratch_operands = 0 : i64, tpu.core_type = #tpu.core_type<tc>, window_params = [{transform_indices = @transform_0, window_bounds = array<i64: 4, 128>}, {pipeline_mode = #tpu.pipeline_mode<synchronous>, transform_indices = @transform_1, window_bounds = array<i64: 32, 4>}, {pipeline_mode = #tpu.pipeline_mode<synchronous>, transform_indices = @transform_2, window_bounds = array<i64: 32, 1>}, {pipeline_mode = #tpu.pipeline_mode<synchronous>, transform_indices = @transform_3, window_bounds = array<i64: 32, 32>}, {pipeline_mode = #tpu.pipeline_mode<synchronous>, transform_indices = @transform_4, window_bounds = array<i64: 32, 1>}, {pipeline_mode = #tpu.pipeline_mode<synchronous>, transform_indices = @transform_5, window_bounds = array<i64: 32, 32>}, {pipeline_mode = #tpu.pipeline_mode<synchronous>, transform_indices = @transform_6, window_bounds = array<i64: 32, 1>}, {pipeline_mode = #tpu.pipeline_mode<synchronous>, transform_indices = @transform_7, window_bounds = array<i64: 1, 32>}, {pipeline_mode = #tpu.pipeline_mode<synchronous>, transform_indices = @transform_8, window_bounds = array<i64: 1, 1>}, {transform_indices = @transform_9, window_bounds = array<i64: 1, 128>}]} {
    %c0 = arith.constant 0 : index
    %c0_0 = arith.constant 0 : index
    %0 = vector.load %arg1[%c0, %c0_0] : memref<4x128xf32, #tpu.memory_space<vmem>>, vector<4x128xf32>
    %c0_1 = arith.constant 0 : index
    %c0_2 = arith.constant 0 : index
    %1 = vector.load %arg2[%c0_1, %c0_2] : memref<32x4xf32, #tpu.memory_space<vmem>>, vector<32x4xf32>
    %c0_3 = arith.constant 0 : index
    %c0_4 = arith.constant 0 : index
    %2 = vector.load %arg3[%c0_3, %c0_4] : memref<32x1xf32, #tpu.memory_space<vmem>>, vector<32x1xf32>
    %3 = arith.truncf %1 : vector<32x4xf32> to vector<32x4xbf16>
    %4 = arith.truncf %0 : vector<4x128xf32> to vector<4x128xbf16>
    %cst = arith.constant dense<0.000000e+00> : vector<32x128xf32>
    %5 = tpu.matmul %3, %4, %cst {dimension_numbers = #tpu.dot_dimension_numbers<[1], [0], [0], [1], [0, 0, 1, 1], [], []>} : vector<32x4xbf16>, vector<4x128xbf16>, vector<32x128xf32> -> vector<32x128xf32>
    %6 = vector.broadcast %2 : vector<32x1xf32> to vector<32x128xf32>
    %7 = arith.addf %5, %6 : vector<32x128xf32>
    %8 = math.tanh %7 : vector<32x128xf32>
    %c0_5 = arith.constant 0 : index
    %c0_6 = arith.constant 0 : index
    %9 = vector.load %arg4[%c0_5, %c0_6] : memref<32x32xf32, #tpu.memory_space<vmem>>, vector<32x32xf32>
    %c0_7 = arith.constant 0 : index
    %c0_8 = arith.constant 0 : index
    %10 = vector.load %arg5[%c0_7, %c0_8] : memref<32x1xf32, #tpu.memory_space<vmem>>, vector<32x1xf32>
    %11 = arith.truncf %9 : vector<32x32xf32> to vector<32x32xbf16>
    %12 = arith.truncf %8 : vector<32x128xf32> to vector<32x128xbf16>
    %cst_9 = arith.constant dense<0.000000e+00> : vector<32x128xf32>
    %13 = tpu.matmul %11, %12, %cst_9 {dimension_numbers = #tpu.dot_dimension_numbers<[1], [0], [0], [1], [0, 0, 1, 1], [], []>} : vector<32x32xbf16>, vector<32x128xbf16>, vector<32x128xf32> -> vector<32x128xf32>
    %14 = vector.broadcast %10 : vector<32x1xf32> to vector<32x128xf32>
    %15 = arith.addf %13, %14 : vector<32x128xf32>
    %16 = math.tanh %15 : vector<32x128xf32>
    %c0_10 = arith.constant 0 : index
    %c0_11 = arith.constant 0 : index
    %17 = vector.load %arg6[%c0_10, %c0_11] : memref<32x32xf32, #tpu.memory_space<vmem>>, vector<32x32xf32>
    %c0_12 = arith.constant 0 : index
    %c0_13 = arith.constant 0 : index
    %18 = vector.load %arg7[%c0_12, %c0_13] : memref<32x1xf32, #tpu.memory_space<vmem>>, vector<32x1xf32>
    %19 = arith.truncf %17 : vector<32x32xf32> to vector<32x32xbf16>
    %20 = arith.truncf %16 : vector<32x128xf32> to vector<32x128xbf16>
    %cst_14 = arith.constant dense<0.000000e+00> : vector<32x128xf32>
    %21 = tpu.matmul %19, %20, %cst_14 {dimension_numbers = #tpu.dot_dimension_numbers<[1], [0], [0], [1], [0, 0, 1, 1], [], []>} : vector<32x32xbf16>, vector<32x128xbf16>, vector<32x128xf32> -> vector<32x128xf32>
    %22 = vector.broadcast %18 : vector<32x1xf32> to vector<32x128xf32>
    %23 = arith.addf %21, %22 : vector<32x128xf32>
    %24 = math.tanh %23 : vector<32x128xf32>
    %c0_15 = arith.constant 0 : index
    %c0_16 = arith.constant 0 : index
    %25 = vector.load %arg8[%c0_15, %c0_16] : memref<1x32xf32, #tpu.memory_space<vmem>>, vector<1x32xf32>
    %c0_17 = arith.constant 0 : index
    %c0_18 = arith.constant 0 : index
    %26 = vector.load %arg9[%c0_17, %c0_18] : memref<1x1xf32, #tpu.memory_space<vmem>>, vector<1x1xf32>
    %27 = arith.truncf %25 : vector<1x32xf32> to vector<1x32xbf16>
    %28 = arith.truncf %24 : vector<32x128xf32> to vector<32x128xbf16>
    %cst_19 = arith.constant dense<0.000000e+00> : vector<1x128xf32>
    %29 = tpu.matmul %27, %28, %cst_19 {dimension_numbers = #tpu.dot_dimension_numbers<[1], [0], [0], [1], [0, 0, 1, 1], [], []>} : vector<1x32xbf16>, vector<32x128xbf16>, vector<1x128xf32> -> vector<1x128xf32>
    %30 = vector.broadcast %26 : vector<1x1xf32> to vector<1x128xf32>
    %31 = arith.addf %29, %30 : vector<1x128xf32>
    %c0_20 = arith.constant 0 : index
    %c0_21 = arith.constant 0 : index
    %32 = vector.load %arg10[%c0_20, %c0_21] : memref<1x128xf32, #tpu.memory_space<vmem>>, vector<1x128xf32>
    tpu.vector_store %arg10[%c0_20, %c0_21], %31 {strides = array<i32>} : memref<1x128xf32, #tpu.memory_space<vmem>>, vector<1x128xf32>,
    return
  }
  func.func @transform_0(%arg0: i32) -> (i32, i32) {
    %c0_i32 = arith.constant 0 : i32
    %c0_i32_0 = arith.constant 0 : i32
    return %c0_i32, %arg0 : i32, i32
  }
  func.func @transform_1(%arg0: i32) -> (i32, i32) {
    %c0_i32 = arith.constant 0 : i32
    %c0_i32_0 = arith.constant 0 : i32
    %c0_i32_1 = arith.constant 0 : i32
    return %c0_i32, %c0_i32_0 : i32, i32
  }
  func.func @transform_2(%arg0: i32) -> (i32, i32) {
    %c0_i32 = arith.constant 0 : i32
    %c0_i32_0 = arith.constant 0 : i32
    %c0_i32_1 = arith.constant 0 : i32
    return %c0_i32, %c0_i32_0 : i32, i32
  }
  func.func @transform_3(%arg0: i32) -> (i32, i32) {
    %c0_i32 = arith.constant 0 : i32
    %c0_i32_0 = arith.constant 0 : i32
    %c0_i32_1 = arith.constant 0 : i32
    return %c0_i32, %c0_i32_0 : i32, i32
  }
  func.func @transform_4(%arg0: i32) -> (i32, i32) {
    %c0_i32 = arith.constant 0 : i32
    %c0_i32_0 = arith.constant 0 : i32
    %c0_i32_1 = arith.constant 0 : i32
    return %c0_i32, %c0_i32_0 : i32, i32
  }
  func.func @transform_5(%arg0: i32) -> (i32, i32) {
    %c0_i32 = arith.constant 0 : i32
    %c0_i32_0 = arith.constant 0 : i32
    %c0_i32_1 = arith.constant 0 : i32
    return %c0_i32, %c0_i32_0 : i32, i32
  }
  func.func @transform_6(%arg0: i32) -> (i32, i32) {
    %c0_i32 = arith.constant 0 : i32
    %c0_i32_0 = arith.constant 0 : i32
    %c0_i32_1 = arith.constant 0 : i32
    return %c0_i32, %c0_i32_0 : i32, i32
  }
  func.func @transform_7(%arg0: i32) -> (i32, i32) {
    %c0_i32 = arith.constant 0 : i32
    %c0_i32_0 = arith.constant 0 : i32
    %c0_i32_1 = arith.constant 0 : i32
    return %c0_i32, %c0_i32_0 : i32, i32
  }
  func.func @transform_8(%arg0: i32) -> (i32, i32) {
    %c0_i32 = arith.constant 0 : i32
    %c0_i32_0 = arith.constant 0 : i32
    %c0_i32_1 = arith.constant 0 : i32
    return %c0_i32, %c0_i32_0 : i32, i32
  }
  func.func @transform_9(%arg0: i32) -> (i32, i32) {
    %c0_i32 = arith.constant 0 : i32
    %c0_i32_0 = arith.constant 0 : i32
    return %c0_i32, %arg0 : i32, i32
  }
}

</mosaic_0001>

<bundles_post_ra>
// kernel: tpu_custom_call.1
= control target key start
LH: loop header
LB: loop body
LE: loop exit
PB: predicated region body
PF: predicated region fallthrough
CT: control target
= control target key end

     0   :  { %s636_s0 = inlined_call_operand.vmem [shape: f32[4,128], index: 0, kind: input, shape index: {}]   ;;  %s637_s1 = inlined_call_operand.vmem [shape: f32[32,4], index: 1, kind: input, shape index: {}]   ;;  %s638_s2 = inlined_call_operand.vmem [shape: f32[32,1], index: 2, kind: input, shape index: {}]   ;;  %s639_s3 = inlined_call_operand.vmem [shape: f32[32,32], index: 3, kind: input, shape index: {}]   ;;  %s640_s4 = inlined_call_operand.vmem [shape: f32[32,1], index: 4, kind: input, shape index: {}]   ;;  %s641_s5 = inlined_call_operand.vmem [shape: f32[32,32], index: 5, kind: input, shape index: {}]   ;;  %s642_s6 = inlined_call_operand.vmem [shape: f32[32,1], index: 6, kind: input, shape index: {}]   ;;  %s643_s7 = inlined_call_operand.vmem [shape: f32[1,32], index: 7, kind: input, shape index: {}]   ;;  %s644_s8 = inlined_call_operand.<no memory space> [shape: f32[1,1], index: 8, kind: input, shape index: {}]   ;;  %s645_s9 = inlined_call_operand.hbm [shape: f32[1,128], index: 9, kind: output, shape index: {}]  }
   0x1   :  { %v14_v0 = vstv %s644_s8 }
   0x2   :  { %15 = vst [vmem:[#allocation2] sm:$0x1] %v14_v0 }
   0x3   :  { %v36_v1 = vld [vmem:[%s636_s0] sm:$0xf]  ;;  %vm75_vm0 = vcmask 1041408   ;;  %v38_v3 = vld [vmem:[%s637_s1 + $0x8] sm:$0xff]  ;;  %vm68_vm1 = vcmask 31744   ;;  %v39_v6 = vld [vmem:[%s637_s1 + $0x10] sm:$0xff] }
   0x4   :  { %v37_v2 = vld [vmem:[%s637_s1] sm:$0xff]  ;;  %v47_v4 = vpack.c.bf16 %v36_v1, %v36_v1  ;;  %v40_v7 = vld [vmem:[%s637_s1 + $0x18] sm:$0xff]  ;;  %v43_v8 = vld [vmem:[%s638_s2 + $0x10] sm:$0xff]  ;;  %v491_v9 = vmov 0  }
   0x5   :  { %v45_v5 = vpack.c.bf16 %v38_v3, %v37_v2  ;;  %443 = vset.pattern.permute.xlu0 %v491_v9  ;;  %444 = vset.pattern.permute.xlu1 %v491_v9  ;;  %v41_v10 = vld [vmem:[%s638_s2] sm:$0xff]  ;;  %v46_v12 = vpack.c.bf16 %v40_v7, %v39_v6  ;;  %v44_v13 = vld [vmem:[%s638_s2 + $0x18] sm:$0xff]  ;;  %v42_v14 = vld [vmem:[%s638_s2 + $0x8] sm:$0xff] }
   0x6   :  { %438 = vmatprep.subr.msk.bf16.mxu0 %vm75_vm0, %v47_v4  ;;  %v77_v11 = vsel %vm75_vm0, %v47_v4, 0  ;;  %60 = vperm.xlu0 %443, %v43_v8  }
   0x7   :  { %410 = vmatprep.mubr.msk.bf16.mxu0 %vm68_vm1, %v45_v5  ;;  %409 = vmatpush3.bf16.msra.mxu0 %v77_v11 }
   0x8   :  { %50 = vperm.xlu1 %444, %v41_v10  }
   0x9   :  { %16 = vsyncpa [#allocation4], 0  ;;  %v138_v15 = vld [vmem:[%s640_s4 + $0x10] sm:$0xff]  ;;  %v139_v16 = vld [vmem:[%s640_s4 + $0x18] sm:$0xff]  ;;  %vm164_vm2 = vcmask 261120   ;;  %v492_v8 = vmov 0.0  }
   0xa   :  { %411 = vmatmul.mubr.msk.bf16.vlgmr.msra.gmra.mxu0 %vm68_vm1, %v46_v12  ;;  %65 = vperm.xlu0 %443, %v44_v13   ;;  %v136_v17 = vld [vmem:[%s640_s4] sm:$0xff]  ;;  %v137_v18 = vld [vmem:[%s640_s4 + $0x8] sm:$0xff]  ;;  %v230_v19 = vld [vmem:[%s642_s6 + $0x10] sm:$0xff]  ;;  %vm493_vm3 = vmmov 0   ;;  %s494_s10 = smov [#allocation3]  }
   0xb   :  { %v231_v20 = vld [vmem:[%s642_s6 + $0x18] sm:$0xff]  ;;  %v228_v21 = vld [vmem:[%s642_s6] sm:$0xff]  ;;  %v229_v22 = vld [vmem:[%s642_s6 + $0x8] sm:$0xff]  ;;  %s379_s2 = sshll.u32 %s494_s10, 4  ;;  %s380_s2 = int_to_ptr.vmem [resolvable:$true] %s379_s2 }
   0xc   :  { %55 = vperm.xlu1 %444, %v42_v14   ;;  %v316_v23 = vld [vmem:[#allocation2] sm:$0x1]  ;;  %v133_v25 = vld [vmem:[%s639_s3 + $0x8] sm:$0xff]  ;;  %v134_v45 = vld [vmem:[%s639_s3 + $0x10] sm:$0xff]  ;;  %s473_s11 = scalar_lea.vmem %s380_s2, 32  ;;  %p474_p1 = scmp.lt.s32.totalorder %s380_s2, %s380_s2 }
   0xd   :  { %v132_v24 = vld [vmem:[%s639_s3] sm:$0xff]  ;;  %v135_v46 = vld [vmem:[%s639_s3 + $0x18] sm:$0xff]  ;;  %v225_v49 = vld [vmem:[%s641_s5 + $0x8] sm:$0xff] }
   0xe   :  { %156 = vperm.xlu0 %443, %v138_v15   ;;  %v140_v26 = vpack.c.bf16 %v133_v25, %v132_v24  ;;  %v141_v47 = vpack.c.bf16 %v135_v46, %v134_v45  ;;  %v224_v48 = vld [vmem:[%s641_s5] sm:$0xff]  ;;  %v226_v5 = vld [vmem:[%s641_s5 + $0x10] sm:$0xff]  ;;  %v227_v6 = vld [vmem:[%s641_s5 + $0x18] sm:$0xff] }
   0xf   :  { %v232_v50 = vpack.c.bf16 %v225_v49, %v224_v48  ;;  %v233_v7 = vpack.c.bf16 %v227_v6, %v226_v5  ;;  %v315_v25 = vld [vmem:[%s643_s7] sm:$0x1]  ;;  %s469_s7 = scalar_lea.vmem %s380_s2, 16 }
  0x10   :  { %161 = vperm.xlu1 %444, %v139_v16   ;;  %418 = vmatprep.mubr.msk.bf16.mxu1 %vm164_vm2, %v140_v26  ;;  %p470_p0 = scmp.ne.s32.totalorder %s380_s2, %s469_s7  ;;  %p475_p2 = scmp.lt.s32.totalorder %s473_s11, %s469_s7 }
  0x11   :  { %426 = vmatprep.mubr.msk.bf16.mxu0 %vm164_vm2, %v232_v50 }
  0x12   :  { %146 = vperm.xlu0 %443, %v136_v17   ;;  %p476_p3 = por %p475_p2, %p474_p1 }
  0x14   :  { %151 = vperm.xlu1 %444, %v137_v18   ;;  %p477_p4 = pnand %p476_p3, %p470_p0 }
  0x16   :  { %248 = vperm.xlu0 %443, %v230_v19  }
  0x18   :  { %253 = vperm.xlu1 %444, %v231_v20  }
  0x1a   :  { %238 = vperm.xlu0 %443, %v228_v21  }
  0x1c   :  { %243 = vperm.xlu1 %444, %v229_v22  }
  0x1e   :  { %322 = vperm.xlu0 %443, %v316_v23  }
  0x81   :  { %v61_v27 = vpop.permute.xlu0 %60 }
  0x83   :  { %v51_v28 = vpop.permute.xlu1 %50 }
  0x85   :  { %v66_v32 = vpop.permute.xlu0 %65 }
  0x87   :  { %v56_v36 = vpop.permute.xlu1 %55 }
  0x89   :  { %v157_v51 = vpop.permute.xlu0 %156 }
  0x8b   :  { %v162_v52 = vpop.permute.xlu1 %161 }
  0x8d   :  { %v147_v56 = vpop.permute.xlu0 %146 }
  0x8f   :  { %v152_v60 = vpop.permute.xlu1 %151 }
  0x91   :  { %v249_v9 = vpop.permute.xlu0 %248 }
  0x93   :  { %v254_v10 = vpop.permute.xlu1 %253 }
  0x95   :  { %v239_v15 = vpop.permute.xlu0 %238 }
  0x97   :  { %v244_v17 = vpop.permute.xlu1 %243 }
  0xca   :  { %v412_v29 = vpop.f32.mrf.mxu0 }
  0xcb   :  { %v122_v30 = vadd.f32 %v412_v29, %v61_v27  ;;  %v325_v29 = vlaneseq }
  0xcc   :  { %v113_v31 = vpop.f32.mrf.mxu0 }
  0xcd   :  { %v114_v33 = vadd.f32 %v113_v31, %v51_v28  ;;  %445 = vtanh.f32 %v122_v30  ;;  %v317_v28 = vpack.c.bf16 %v315_v25, %v315_v25  ;;  %v326_v30 = vshrl.u32 %v325_v29, 7 }
  0xce   :  { %v413_v34 = vpop.f32.mrf.mxu0 }
  0xcf   :  { %v125_v35 = vadd.f32 %v413_v34, %v66_v32  ;;  %v327_v31 = vsub.s32 0, %v326_v30  ;;  %v323_v32 = vpop.permute.xlu0 %322 }
  0xd0   :  { %v116_v37 = vpop.f32.mrf.mxu0 }
  0xd1   :  { %447 = vtanh.f32 %v125_v35  ;;  %v117_v38 = vadd.f32 %v116_v37, %v56_v36 }
  0xd2   :  { %449 = vtanh.f32 %v114_v33  ;;  %v328_v33 = vrot.slane %v323_v32, %v327_v31 }
  0xd3   :  { %451 = vtanh.f32 %v117_v38 }
  0xda   :  { %v446_v39 = vpop.eup %445 }
  0xde   :  { %v448_v40 = vpop.eup %447 }
  0xdf   :  { %v450_v41 = vpop.eup %449  ;;  %v143_v42 = vpack.c.bf16 %v448_v40, %v446_v39 }
  0xe0   :  { %v452_v43 = vpop.eup %451 }
  0xe1   :  { %414 = vmatprep.subr.bf16.mxu1 %v143_v42  ;;  %v142_v44 = vpack.c.bf16 %v452_v43, %v450_v41 }
  0xe2   :  { %415 = vmatpush3.bf16.msra.mxu1 %v143_v42 }
  0xe3   :  { %416 = vmatprep.subr.bf16.mxu1 %v142_v44 }
  0xe6   :  { %417 = vmatpush3.bf16.msra.mxu1 %v142_v44 }
  0xe7   :  { %430 = vmatprep.subr.bf16.mxu1 %v492_v8 }
  0xe9   :  { %419 = vmatmul.mubr.msk.bf16.vlgmr.msra.gmra.mxu1 %vm164_vm2, %v141_v47 }
  0xea   :  { %434 = vmatprep.mubr.msk.bf16.mxu1 %vm493_vm3, %v492_v8 }
 0x1a9   :  { %v420_v53 = vpop.f32.mrf.mxu1 }
 0x1aa   :  { %v214_v54 = vadd.f32 %v420_v53, %v157_v51 }
 0x1ab   :  { %v205_v55 = vpop.f32.mrf.mxu1 }
 0x1ac   :  { %v206_v57 = vadd.f32 %v205_v55, %v147_v56  ;;  %453 = vtanh.f32 %v214_v54 }
 0x1ad   :  { %v421_v58 = vpop.f32.mrf.mxu1 }
 0x1ae   :  { %v217_v59 = vadd.f32 %v421_v58, %v162_v52 }
 0x1af   :  { %v208_v61 = vpop.f32.mrf.mxu1 }
 0x1b0   :  { %455 = vtanh.f32 %v217_v59  ;;  %v209_v62 = vadd.f32 %v208_v61, %v152_v60 }
 0x1b1   :  { %457 = vtanh.f32 %v206_v57 }
 0x1b2   :  { %459 = vtanh.f32 %v209_v62 }
 0x1b9   :  { %v454_v63 = vpop.eup %453 }
 0x1bd   :  { %v456_v0 = vpop.eup %455 }
 0x1be   :  { %v458_v1 = vpop.eup %457  ;;  %v235_v2 = vpack.c.bf16 %v456_v0, %v454_v63 }
 0x1bf   :  { %v460_v3 = vpop.eup %459 }
 0x1c0   :  { %422 = vmatprep.subr.bf16.mxu0 %v235_v2  ;;  %v234_v4 = vpack.c.bf16 %v460_v3, %v458_v1 }
 0x1c1   :  { %423 = vmatpush3.bf16.msra.mxu0 %v235_v2 }
 0x1c2   :  { %424 = vmatprep.subr.bf16.mxu0 %v234_v4 }
 0x1c5   :  { %425 = vmatpush3.bf16.msra.mxu0 %v234_v4 }
 0x1c8   :  { %427 = vmatmul.mubr.msk.bf16.vlgmr.msra.gmra.mxu0 %vm164_vm2, %v233_v7 }
 0x288   :  { %v428_v11 = vpop.f32.mrf.mxu0 }
 0x289   :  { %v305_v12 = vadd.f32 %v428_v11, %v249_v9 }
 0x28a   :  { %v296_v13 = vpop.f32.mrf.mxu0 }
 0x28b   :  { %461 = vtanh.f32 %v305_v12  ;;  %v297_v19 = vadd.f32 %v296_v13, %v239_v15 }
 0x28c   :  { %v429_v14 = vpop.f32.mrf.mxu0 }
 0x28d   :  { %v308_v16 = vadd.f32 %v429_v14, %v254_v10 }
 0x28e   :  { %v299_v18 = vpop.f32.mrf.mxu0 }
 0x28f   :  { %463 = vtanh.f32 %v308_v16  ;;  %v300_v20 = vadd.f32 %v299_v18, %v244_v17 }
 0x291   :  { %465 = vtanh.f32 %v300_v20 }
 0x292   :  { %467 = vtanh.f32 %v297_v19 }
 0x298   :  { %v462_v21 = vpop.eup %461 }
 0x29c   :  { %v464_v22 = vpop.eup %463 }
 0x29d   :  { %v319_v23 = vpack.c.bf16 %v464_v22, %v462_v21 }
 0x29e   :  { %v466_v24 = vpop.eup %465 }
 0x29f   :  { %431 = vmatpush3.bf16.msra.mxu1 %v319_v23  ;;  %v468_v26 = vpop.eup %467 }
 0x2a0   :  { %432 = vmatprep.subr.bf16.mxu1 %v492_v8  ;;  %v318_v27 = vpack.c.bf16 %v466_v24, %v468_v26 }
 0x2a3   :  { %433 = vmatpush3.bf16.msra.mxu1 %v318_v27 }
 0x2a6   :  { %435 = vmatmul.mubr.msk.bf16.vlgmr.msra.gmra.mxu1 %vm164_vm2, %v317_v28 }
 0x366   :  { %v366_v34 = vpop.f32.mrf.mxu1 }
 0x367   :  { %v367_v35 = vadd.f32 %v366_v34, %v328_v33 }
 0x368   :  { %v436_v36 = vpop.f32.mrf.mxu1 }
 0x369   :  { %372 = vst [vmem:[#allocation3] sm:$0x1] %v367_v35 }
 0x36a   :  { %v369_v37 = vpop.f32.mrf.mxu1 }
 0x36b   :  { %480 = shalt.err (!%p477_p4)
}
 0x36c   :  { %382 = dma.vmem_to_hbm [thread:$0]  %s380_s2, 16, %s645_s9, [#allocation4]   ;;  %v437_v38 = vpop.f32.mrf.mxu1 }
 0x36d   :  { %489 = dma.done.wait [#allocation4], 16  }
 0x36e   :  { %490 = vsyncadd [#allocation4], 4294967280 }
 0x36f   :  { %386 = vsyncpa [#allocation4], 1 }

</bundles_post_ra>
